<compile_context>
chip_gen: v7x
topology: tpu7x:2x2x1
jax: 0.10.0
libtpu: 0.0.40
codegen_flags: <defaults>
</compile_context>

<pallas_src>
import jax
import jax.numpy as jnp
from jax.experimental import pallas as pl
from jax.experimental.pallas import tpu as pltpu

# --- module hyperparameters (from ALPA.__init__ defaults) ---
GAMMA_NEG = 4
GAMMA_POS = 0
CLIP = 0.05
ALPHA = 0.875
BETA = 1.625
A0, A1, B1 = -1.5, 1.5, 0.0   # pade_approximation_plus coefficients
C0, C1, D1 = -1.0, 1.0, 0.0   # pade_approximation_minus coefficients

_MIN_SPLIT_ROWS = 2048   # above this, force >=2 grid blocks (v7x dual-TC)
_INTERM_F32 = 6          # f32-wide temporaries assumed live across the tile


def _ipow(v, n: int):
    """v ** n for a small non-negative Python int n, via repeated multiplies."""
    if n == 0:
        return jnp.ones_like(v)
    result = None
    base = v
    while n:
        if n & 1:
            result = base if result is None else result * base
        n >>= 1
        if n:
            base = base * base
    return result


def _round_up(v: int, m: int) -> int:
    return -(-v // m) * m


def _vmem_capacity_bytes() -> int:
    try:
        return int(pltpu.get_tpu_info().vmem_capacity_bytes)
    except Exception:
        return 64 * 1024 * 1024   # v7x-safe fallback


def _choose_tb(B: int, C: int, itemsizes, vmem_cap: int) -> int:
    """Row-tile size chosen by bytes: 2 pipeline buffers per input plus the
    f32 intermediate working set must fit inside ~60% of physical VMEM."""
    per_row = 2 * C * sum(itemsizes) + _INTERM_F32 * 4 * C
    budget = int(vmem_cap * 0.6)
    # sublane packing: f32 -> 8, bf16 -> 16, int8 -> 32 row alignment
    align = 8 * max(1, 4 // min(itemsizes))
    max_rows = max(align, budget // per_row)
    tb = max(align, (max_rows // align) * align)
    if B <= tb:
        if B >= _MIN_SPLIT_ROWS:
            # Split into >=2 blocks so the "parallel" grid axis can be sharded
            # across both TensorCores on v7x; each half is still large enough
            # to amortize the ~0.35us per-grid-step overhead.
            return min(B, _round_up(-(-B // 2), align))
        return B          # single full-extent block
    return tb
    # TODO(synk): if a huge num_classes ever forces tb tiny, deepen the DMA
    # pipeline with pipeline_mode=pl.Buffered(3) on the input BlockSpecs.


def _make_kernel(B: int, C: int, tb: int, hard_labels: bool):
    need_row_mask = (B % tb) != 0

    def kernel(x_ref, y_ref, out_ref):
        x = x_ref[...].astype(jnp.float32)
        y = y_ref[...].astype(jnp.float32)

        xs_pos = jax.nn.sigmoid(x)
        xs_neg = 1.0 - xs_pos
        if CLIP is not None and CLIP > 0:
            xs_neg = jnp.minimum(xs_neg + CLIP, 1.0)   # (xs_neg + clip).clamp(max=1)

        # Pade approximations; denominators constant-folded when b_1/d_1 == 0.
        l_plus = A0 + A1 * xs_pos
        if B1 != 0:
            l_plus = l_plus / (1.0 + B1 * xs_pos)      # exact divide if ever enabled
        l_minus = C0 + C1 * xs_neg
        if D1 != 0:
            l_minus = l_minus / (1.0 + D1 * xs_neg)

        if hard_labels:
            # Exact for y in {0,1}: the y*, (1-y)*, pt and focal-weight terms
            # collapse into one select.
            pos_branch = ALPHA * l_plus
            if GAMMA_POS > 0:
                pos_branch = pos_branch * _ipow(xs_neg * (1.0 - xs_pos), GAMMA_POS)
            neg_branch = BETA * l_minus
            if GAMMA_NEG > 0:
                neg_branch = neg_branch * _ipow(xs_pos * (1.0 - xs_neg), GAMMA_NEG)
            loss = jnp.where(y > 0.5, pos_branch, neg_branch)
        else:
            # General soft-label path (matches the PyTorch math for y in [0,1]).
            pos_term = ALPHA * y * l_plus
            if GAMMA_POS > 0:
                pos_term = pos_term * _ipow(xs_neg, GAMMA_POS)
            neg_term = BETA * (1.0 - y) * l_minus
            if GAMMA_NEG > 0:
                neg_term = neg_term * _ipow(xs_pos, GAMMA_NEG)
            loss = pos_term + neg_term
            if GAMMA_NEG > 0 or GAMMA_POS > 0:
                pt = xs_pos * y + xs_neg * (1.0 - y)
                base = 1.0 - pt
                g = GAMMA_POS * y + GAMMA_NEG * (1.0 - y)
                # safe pow via exp/log (matches torch.pow for base >= 0,
                # incl. 0**0 == 1 and 0**g == 0).  EUP-heavy: avoid on v5e hot paths.
                logb = jnp.log(jnp.maximum(base, jnp.float32(1e-38)))
                w = jnp.exp(g * logb)
                w = jnp.where(base <= 0.0, jnp.where(g == 0.0, 1.0, 0.0), w)
                loss = loss * w

        # Mask padded rows of a partial trailing block (select, so garbage /
        # NaN from the OOB region can never leak into the sum).
        if need_row_mask:
            i = pl.program_id(0)
            row = jax.lax.broadcasted_iota(jnp.int32, loss.shape, 0) + i * tb
            loss = jnp.where(row < B, loss, 0.0)

        # Rows-only (sublane) reduce; lane reduction finishes in the wrapper.
        partial_row = jnp.sum(loss, axis=0)                       # (C,)
        out_ref[...] = jnp.broadcast_to(partial_row[None, None, :], (1, 8, C))

    return kernel


def alpa_loss(x, y, *, hard_labels=True):
    """Pallas implementation of ALPA.forward(x, y) -> scalar loss.

    x, y: (batch, num_classes).  Narrow dtypes (bf16 x and/or bf16/int8 y) are
    accepted and upcast in-kernel (bf16 y is exact for hard {0,1} labels).
    Set hard_labels=False if y may contain soft (non-{0,1}) labels.
    """
    B, C = x.shape
    assert y.shape == (B, C)

    itemsizes = (jnp.dtype(x.dtype).itemsize, jnp.dtype(y.dtype).itemsize)
    vmem_cap = _vmem_capacity_bytes()
    tb = _choose_tb(B, C, itemsizes, vmem_cap)
    nb = pl.cdiv(B, tb)

    kernel = _make_kernel(B, C, tb, hard_labels)

    partials = pl.pallas_call(
        kernel,
        out_shape=jax.ShapeDtypeStruct((nb, 8, C), jnp.float32),
        grid_spec=pltpu.PrefetchScalarGridSpec(
            num_scalar_prefetch=0,
            grid=(nb,),
            in_specs=[
                pl.BlockSpec((tb, C), lambda i: (i, 0)),
                pl.BlockSpec((tb, C), lambda i: (i, 0)),
            ],
            out_specs=pl.BlockSpec((1, 8, C), lambda i: (i, 0, 0)),
        ),
        compiler_params=pltpu.CompilerParams(
            dimension_semantics=("parallel",),
            vmem_limit_bytes=int(vmem_cap * 0.75),
        ),
    )(x, y)

    # Each grid step wrote its (C,) partial replicated across 8 sublanes;
    # read sublane 0 only and finish the (tiny) reduction here.
    return -jnp.sum(partials[:, 0, :])


def _alpa_loss_ref(x, y):
    """Pure-JAX reference mirroring the PyTorch forward."""
    x = x.astype(jnp.float32)
    y = y.astype(jnp.float32)
    xs_pos = jax.nn.sigmoid(x)
    xs_neg = 1.0 - xs_pos
    xs_neg = jnp.minimum(xs_neg + CLIP, 1.0)
    l_plus = (A0 + A1 * xs_pos) / (1.0 + B1 * xs_pos)
    l_minus = (C0 + C1 * xs_neg) / (1.0 + D1 * xs_neg)
    loss = (ALPHA * y * xs_neg ** GAMMA_POS * l_plus
            + BETA * (1.0 - y) * xs_pos ** GAMMA_NEG * l_minus)
    pt = xs_pos * y + xs_neg * (1.0 - y)
    g = GAMMA_POS * y + GAMMA_NEG * (1.0 - y)
    loss = loss * jnp.power(1.0 - pt, g)
    return -jnp.sum(loss)


if __name__ == "__main__":
    key = jax.random.PRNGKey(0)
    kx, ky = jax.random.split(key)
    B, C = 16, 128   # (batch_size, num_classes) — small demo shapes
    x = jax.random.normal(kx, (B, C), dtype=jnp.float32)
    # hard {0,1} labels passed in bf16 (exact; halves label HBM traffic)
    y = jax.random.bernoulli(ky, p=0.3, shape=(B, C)).astype(jnp.bfloat16)

    out = alpa_loss(x, y)
    jax.block_until_ready(out)

    ref = _alpa_loss_ref(x, y)
    assert jnp.allclose(out, ref, rtol=1e-4, atol=1e-3), (out, ref)
    print("KERNEL_OK")
</pallas_src>

<mosaic_0001>
module attributes {stable_mosaic.version = 11 : i64} {
  func.func @kernel(%arg0: i32, %arg1: memref<16x128xf32, #tpu.memory_space<vmem>>, %arg2: memref<16x128xbf16, #tpu.memory_space<vmem>>, %arg3: memref<1x8x128xf32, #tpu.memory_space<vmem>>) attributes {dimension_semantics = [#tpu.dimension_semantics<parallel>], iteration_bounds = array<i64: 1>, scalar_prefetch = 0 : i64, scratch_operands = 0 : i64, tpu.core_type = #tpu.core_type<tc>, window_params = [{transform_indices = @transform_0, window_bounds = array<i64: 16, 128>}, {transform_indices = @transform_1, window_bounds = array<i64: 16, 128>}, {transform_indices = @transform_2, window_bounds = array<i64: 1, 8, 128>}]} {
    %c0 = arith.constant 0 : index
    %c0_0 = arith.constant 0 : index
    %0 = vector.load %arg1[%c0, %c0_0] : memref<16x128xf32, #tpu.memory_space<vmem>>, vector<16x128xf32>
    %c0_1 = arith.constant 0 : index
    %c0_2 = arith.constant 0 : index
    %1 = vector.load %arg2[%c0_1, %c0_2] : memref<16x128xbf16, #tpu.memory_space<vmem>>, vector<16x128xbf16>
    %2 = arith.extf %1 : vector<16x128xbf16> to vector<16x128xf32>
    %3 = arith.negf %0 : vector<16x128xf32>
    %4 = math.exp %3 : vector<16x128xf32>
    %cst = arith.constant 1.000000e+00 : f32
    %5 = vector.broadcast %cst : f32 to vector<16x128xf32>
    %6 = arith.addf %5, %4 : vector<16x128xf32>
    %7 = arith.divf %5, %6 : vector<16x128xf32>
    %cst_3 = arith.constant 1.000000e+00 : f32
    %8 = vector.broadcast %cst_3 : f32 to vector<16x128xf32>
    %9 = arith.subf %8, %7 : vector<16x128xf32>
    %cst_4 = arith.constant 5.000000e-02 : f32
    %10 = vector.broadcast %cst_4 : f32 to vector<16x128xf32>
    %11 = arith.addf %9, %10 : vector<16x128xf32>
    %cst_5 = arith.constant 1.000000e+00 : f32
    %12 = vector.broadcast %cst_5 : f32 to vector<16x128xf32>
    %13 = arith.minimumf %11, %12 : vector<16x128xf32>
    %cst_6 = arith.constant 1.500000e+00 : f32
    %14 = vector.broadcast %cst_6 : f32 to vector<16x128xf32>
    %15 = arith.mulf %14, %7 : vector<16x128xf32>
    %cst_7 = arith.constant -1.500000e+00 : f32
    %16 = vector.broadcast %cst_7 : f32 to vector<16x128xf32>
    %17 = arith.addf %16, %15 : vector<16x128xf32>
    %cst_8 = arith.constant 1.000000e+00 : f32
    %18 = vector.broadcast %cst_8 : f32 to vector<16x128xf32>
    %19 = arith.mulf %18, %13 : vector<16x128xf32>
    %cst_9 = arith.constant -1.000000e+00 : f32
    %20 = vector.broadcast %cst_9 : f32 to vector<16x128xf32>
    %21 = arith.addf %20, %19 : vector<16x128xf32>
    %cst_10 = arith.constant 8.750000e-01 : f32
    %22 = vector.broadcast %cst_10 : f32 to vector<16x128xf32>
    %23 = arith.mulf %22, %17 : vector<16x128xf32>
    %cst_11 = arith.constant 1.625000e+00 : f32
    %24 = vector.broadcast %cst_11 : f32 to vector<16x128xf32>
    %25 = arith.mulf %24, %21 : vector<16x128xf32>
    %cst_12 = arith.constant 1.000000e+00 : f32
    %26 = vector.broadcast %cst_12 : f32 to vector<16x128xf32>
    %27 = arith.subf %26, %13 : vector<16x128xf32>
    %28 = arith.mulf %7, %27 : vector<16x128xf32>
    %29 = arith.mulf %28, %28 : vector<16x128xf32>
    %30 = arith.mulf %29, %29 : vector<16x128xf32>
    %31 = arith.mulf %25, %30 : vector<16x128xf32>
    %cst_13 = arith.constant 5.000000e-01 : f32
    %32 = vector.broadcast %cst_13 : f32 to vector<16x128xf32>
    %33 = arith.cmpf ogt, %2, %32 : vector<16x128xf32>
    %34 = arith.select %33, %23, %31 : vector<16x128xi1>, vector<16x128xf32>
    %cst_14 = arith.constant dense<0.000000e+00> : vector<128xf32>
    %35 = vector.multi_reduction <add>, %34, %cst_14 [0] : vector<16x128xf32> to vector<128xf32>
    %36 = vector.shape_cast %35 : vector<128xf32> to vector<1x1x128xf32>
    %37 = vector.shape_cast %36 : vector<1x1x128xf32> to vector<1x1x128xf32>
    %38 = vector.broadcast %37 : vector<1x1x128xf32> to vector<1x8x128xf32>
    %c0_15 = arith.constant 0 : index
    %c0_16 = arith.constant 0 : index
    %c0_17 = arith.constant 0 : index
    %39 = vector.load %arg3[%c0_15, %c0_16, %c0_17] : memref<1x8x128xf32, #tpu.memory_space<vmem>>, vector<1x8x128xf32>
    tpu.vector_store %arg3[%c0_15, %c0_16, %c0_17], %38 {strides = array<i32>} : memref<1x8x128xf32, #tpu.memory_space<vmem>>, vector<1x8x128xf32>,
    return
  }
  func.func @transform_0(%arg0: i32) -> (i32, i32) {
    %c0_i32 = arith.constant 0 : i32
    %c0_i32_0 = arith.constant 0 : i32
    return %arg0, %c0_i32 : i32, i32
  }
  func.func @transform_1(%arg0: i32) -> (i32, i32) {
    %c0_i32 = arith.constant 0 : i32
    %c0_i32_0 = arith.constant 0 : i32
    return %arg0, %c0_i32 : i32, i32
  }
  func.func @transform_2(%arg0: i32) -> (i32, i32, i32) {
    %c0_i32 = arith.constant 0 : i32
    %c0_i32_0 = arith.constant 0 : i32
    %c0_i32_1 = arith.constant 0 : i32
    return %arg0, %c0_i32, %c0_i32_0 : i32, i32, i32
  }
}

</mosaic_0001>

<bundles_post_ra>
// kernel: tpu_custom_call.1
= control target key start
LH: loop header
LB: loop body
LE: loop exit
PB: predicated region body
PF: predicated region fallthrough
CT: control target
= control target key end

     0   :  { %7 = vsyncpa [#allocation3], 0  ;;  %s263_s0 = inlined_call_operand.hbm [shape: f32[16,128], index: 0, kind: input, shape index: {}]   ;;  %s264_s1 = inlined_call_operand.hbm [shape: bf16[16,128], index: 1, kind: input, shape index: {}]   ;;  %s265_s2 = inlined_call_operand.hbm [shape: f32[1,8,128], index: 2, kind: output, shape index: {}]  }
   0x1   :  { %8 = vsyncpa [#allocation6], 0 }
   0x2   :  { %9 = vsyncpa [#allocation4], 0  ;;  %s205_s9 = smov [#allocation2]   ;;  %s133_s13 = scalar_lea.hbm %s263_s0, 256 }
   0x3   :  { %s15_s10 = sshll.u32 %s205_s9, 4  ;;  %p134_p0 = scmp.ne.s32.totalorder %s263_s0, %s133_s13  ;;  %s16_s10 = int_to_ptr.vmem [resolvable:$true] %s15_s10 }
   0x4   :  { %p137_p1 = scmp.lt.u32.totalorder %s133_s13, %s263_s0 }
   0x6   :  { %p139_p2 = pnand %p137_p1, %p134_p0 }
   0x8   :  { %142 = shalt.err (!%p139_p2)
}
   0x9   :  { %s143_s18 = scalar_lea.vmem %s16_s10, 256  ;;  %p148_p4 = scmp.lt.s32.totalorder %s16_s10, %s16_s10 }
   0xa   :  { %p144_p3 = scmp.ne.s32.totalorder %s16_s10, %s143_s18  ;;  %p149_p5 = scmp.lt.s32.totalorder %s143_s18, %s143_s18 }
   0xc   :  { %p150_p6 = por %p149_p5, %p148_p4 }
   0xe   :  { %p151_p7 = pnand %p150_p6, %p144_p3 }
  0x10   :  { %154 = shalt.err (!%p151_p7)
}
  0x11   :  { %s206_s19 = smov 128   ;;  %s207_s20 = smov 8  }
  0x12   :  { %21 = dma.hbm_to_vmem [thread:$0]  %s263_s0, 256, %s16_s10, [#allocation3], %s206_s19, %s206_s19, %s207_s20  }
  0x13   :  { %s208_s23 = smov [#allocation5]   ;;  %s155_s27 = scalar_lea.hbm %s264_s1, 128 }
  0x14   :  { %s27_s24 = sshll.u32 %s208_s23, 4  ;;  %p156_p8 = scmp.ne.s32.totalorder %s264_s1, %s155_s27  ;;  %s28_s24 = int_to_ptr.vmem [resolvable:$true] %s27_s24 }
  0x15   :  { %p159_p9 = scmp.lt.u32.totalorder %s155_s27, %s264_s1 }
  0x17   :  { %p161_p10 = pnand %p159_p9, %p156_p8 }
  0x19   :  { %164 = shalt.err (!%p161_p10)
}
  0x1a   :  { %s165_s4 = scalar_lea.vmem %s28_s24, 128  ;;  %p170_p12 = scmp.lt.s32.totalorder %s28_s24, %s28_s24 }
  0x1b   :  { %p166_p11 = scmp.ne.s32.totalorder %s28_s24, %s165_s4  ;;  %p171_p13 = scmp.lt.s32.totalorder %s165_s4, %s165_s4 }
  0x1d   :  { %p172_p0 = por %p171_p13, %p170_p12 }
  0x1f   :  { %p173_p1 = pnand %p172_p0, %p166_p11 }
  0x21   :  { %176 = shalt.err (!%p173_p1)
}
  0x22   :  { %s209_s0 = smov 64   ;;  %s210_s5 = smov 4  }
  0x23   :  { %33 = dma.hbm_to_vmem [thread:$0]  %s264_s1, 128, %s28_s24, [#allocation6], %s209_s0, %s209_s0, %s210_s5  }
  0x24   :  { %199 = dma.done.wait [#allocation3], 256  }
  0x25   :  { %200 = vsyncadd [#allocation3], 4294967040 }
  0x26   :  { %201 = dma.done.wait [#allocation6], 128  }
  0x27   :  { %202 = vsyncadd [#allocation6], 4294967168  ;;  %v40_v0 = vld [vmem:[#allocation2] sm:$0xff]  ;;  %v41_v1 = vld [vmem:[#allocation2 + $0x8] sm:$0xff]  ;;  %s211_s1 = smov [#allocation7]  }
  0x28   :  { %v112_v2 = vmul.f32 -1.442695, %v40_v0  ;;  %v113_v3 = vmul.f32 -1.442695, %v41_v1  ;;  %v115_v18 = vld [vmem:[#allocation5] sm:$0xff]   ;;  %s102_s8 = sshll.u32 %s211_s1, 4  ;;  %s103_s8 = int_to_ptr.vmem [resolvable:$true] %s102_s8 }
  0x29   :  { %v116_v25 = vunpack.c.l.bf16 %v115_v18  ;;  %v117_v28 = vunpack.c.h.bf16 %v115_v18  ;;  %s177_s9 = scalar_lea.vmem %s103_s8, 128  ;;  %p182_p3 = scmp.lt.s32.totalorder %s103_s8, %s103_s8 }
  0x2a   :  { %125 = vpow2.f32 %v112_v2  ;;  %p178_p2 = scmp.ne.s32.totalorder %s103_s8, %s177_s9  ;;  %p183_p4 = scmp.lt.s32.totalorder %s177_s9, %s177_s9 }
  0x2b   :  { %127 = vpow2.f32 %v113_v3  ;;  %vm84_vm0 = vcmp.gt.f32.partialorder %v116_v25, 0.5  ;;  %vm85_vm1 = vcmp.gt.f32.partialorder %v117_v28, 0.5 }
  0x2c   :  { %p184_p5 = por %p183_p4, %p182_p3 }
  0x2e   :  { %p185_p6 = pnand %p184_p5, %p178_p2 }
  0x34   :  { %v126_v4 = vpop.eup %125 }
  0x35   :  { %v128_v5 = vpop.eup %127  ;;  %v52_v6 = vadd.f32 1.0, %v126_v4 }
  0x36   :  { %v53_v7 = vadd.f32 1.0, %v128_v5 }
  0x37   :  { %129 = vrcp.f32 %v52_v6 }
  0x38   :  { %131 = vrcp.f32 %v53_v7 }
  0x41   :  { %v130_v8 = vpop.eup %129 }
  0x42   :  { %v132_v9 = vpop.eup %131  ;;  %v58_v10 = vsub.f32 1.0, %v130_v8  ;;  %v64_v15 = vmul.f32 1.5, %v130_v8 }
  0x43   :  { %v59_v11 = vsub.f32 1.0, %v132_v9  ;;  %v65_v17 = vmul.f32 1.5, %v132_v9 }
  0x44   :  { %v60_v12 = vadd.f32 0.05, %v58_v10  ;;  %v66_v23 = vadd.f32 -1.5, %v64_v15 }
  0x45   :  { %v61_v13 = vadd.f32 0.05, %v59_v11  ;;  %v67_v26 = vadd.f32 -1.5, %v65_v17 }
  0x46   :  { %v62_v14 = vmin.f32 %v60_v12, 1.0  ;;  %v70_v33 = vmul.f32 0.875, %v66_v23 }
  0x47   :  { %v63_v16 = vmin.f32 %v61_v13, 1.0  ;;  %v71_v35 = vmul.f32 0.875, %v67_v26 }
  0x48   :  { %v68_v19 = vadd.f32 -1.0, %v62_v14  ;;  %v74_v20 = vsub.f32 1.0, %v62_v14 }
  0x49   :  { %v69_v21 = vadd.f32 -1.0, %v63_v16  ;;  %v75_v22 = vsub.f32 1.0, %v63_v16 }
  0x4a   :  { %v76_v24 = vmul.f32 %v130_v8, %v74_v20  ;;  %v72_v29 = vmul.f32 1.625, %v68_v19 }
  0x4b   :  { %v77_v27 = vmul.f32 %v132_v9, %v75_v22  ;;  %v73_v31 = vmul.f32 1.625, %v69_v21 }
  0x4c   :  { %v78_v30 = vmul.f32 %v76_v24, %v76_v24 }
  0x4d   :  { %v79_v32 = vmul.f32 %v77_v27, %v77_v27 }
  0x4e   :  { %v80_v34 = vmul.f32 %v78_v30, %v78_v30 }
  0x4f   :  { %v81_v36 = vmul.f32 %v79_v32, %v79_v32 }
  0x50   :  { %v82_v37 = vmul.f32 %v80_v34, %v72_v29 }
  0x51   :  { %v83_v38 = vmul.f32 %v81_v36, %v73_v31 }
  0x52   :  { %v86_v39 = vsel %vm84_vm0, %v70_v33, %v82_v37 }
  0x53   :  { %v87_v40 = vsel %vm85_vm1, %v71_v35, %v83_v38 }
  0x54   :  { %v88_v41 = vadd.f32 %v87_v40, %v86_v39 }
  0x56   :  { %v89_v42 = vrot.slane %v88_v41, 4 }
  0x58   :  { %v90_v43 = vadd.f32 %v89_v42, %v88_v41 }
  0x5a   :  { %v91_v44 = vrot.slane %v90_v43, 2 }
  0x5c   :  { %v92_v45 = vadd.f32 %v91_v44, %v90_v43 }
  0x5e   :  { %v93_v46 = vrot.slane %v92_v45, 1 }
  0x60   :  { %v94_v47 = vadd.f32 %v93_v46, %v92_v45 }
  0x62   :  { %95 = vst [vmem:[#allocation7] sm:$0xff] %v94_v47 }
  0x63   :  { %188 = shalt.err (!%p185_p6)
}
  0x64   :  { %s189_s12 = scalar_lea.hbm %s265_s2, 128 }
  0x65   :  { %p190_p7 = scmp.ne.s32.totalorder %s265_s2, %s189_s12  ;;  %p193_p8 = scmp.lt.u32.totalorder %s189_s12, %s265_s2 }
  0x67   :  { %p195_p9 = pnand %p193_p8, %p190_p7 }
  0x69   :  { %198 = shalt.err (!%p195_p9)
}
  0x6a   :  { %105 = dma.vmem_to_hbm [thread:$0]  %s103_s8, 128, %s265_s2, [#allocation4]  }
  0x6b   :  { %203 = dma.done.wait [#allocation4], 128  }
  0x6c   :  { %204 = vsyncadd [#allocation4], 4294967168 }
  0x6d   :  { %109 = vsyncpa [#allocation3], 1 }
  0x6e   :  { %110 = vsyncpa [#allocation6], 1 }
  0x6f   :  { %111 = vsyncpa [#allocation4], 1 }

</bundles_post_ra>
